<compile_context>
chip_gen: v7x
topology: tpu7x:2x2x1
jax: 0.10.0
libtpu: 0.0.40
codegen_flags: <defaults>
</compile_context>

<pallas_src>
import functools

import jax
import jax.numpy as jnp
from jax.experimental import pallas as pl
from jax.experimental.pallas import tpu as pltpu

_LANE = 128
_SUBLANE_F32 = 8
_SUBLANE_BF16 = 16


def _round_up(x: int, m: int) -> int:
    return ((x + m - 1) // m) * m


def _pad2d(a, rows, cols):
    r, c = a.shape
    return jnp.pad(a, ((0, rows - r), (0, cols - c)))


# ---------------------------------------------------------------------------
# Fused Pallas kernel: whole MlpExtractor forward for one batch tile.
# ---------------------------------------------------------------------------
def _fused_mlp_kernel(*refs, n_shared: int, n_pi: int, n_vf: int, use_bf16: bool):
    n_layers = n_shared + n_pi + n_vf
    x_ref = refs[0]
    w_refs = refs[1:1 + n_layers]
    b_refs = refs[1 + n_layers:1 + 2 * n_layers]
    pi_ref = refs[1 + 2 * n_layers]
    vf_ref = refs[2 + 2 * n_layers]

    def layer(h, w_ref, b_ref):
        w = w_ref[...]
        lhs = h
        if use_bf16:
            # MXU-friendly operands on v6e/v7x; accumulate + bias + tanh in f32.
            lhs = lhs.astype(jnp.bfloat16)
            w = w.astype(jnp.bfloat16)
        y = jnp.dot(lhs, w, preferred_element_type=jnp.float32)
        return jnp.tanh(y + b_ref[...])

    h = x_ref[...].astype(jnp.float32)
    for i in range(n_shared):
        h = layer(h, w_refs[i], b_refs[i])

    pi = h
    for i in range(n_shared, n_shared + n_pi):
        pi = layer(pi, w_refs[i], b_refs[i])

    vf = h
    for i in range(n_shared + n_pi, n_layers):
        vf = layer(vf, w_refs[i], b_refs[i])

    pi_ref[...] = pi.astype(pi_ref.dtype)
    vf_ref[...] = vf.astype(vf_ref.dtype)


# ---------------------------------------------------------------------------
# Wrapper: padding, batch-tiled grid, single pallas_call.
# ---------------------------------------------------------------------------
def mlp_extractor_forward(features, shared_params, pi_params, vf_params,
                          *, batch_tile=None, use_bf16=False):
    """Fused forward pass; returns (latent_pi, latent_vf) like MlpExtractor."""
    B, feat = features.shape
    n_shared, n_pi, n_vf = len(shared_params), len(pi_params), len(vf_params)
    all_params = list(shared_params) + list(pi_params) + list(vf_params)

    # Logical output widths (match MlpExtractor.latent_dim_pi / latent_dim_vf).
    last_shared = shared_params[-1][0].shape[1] if n_shared else feat
    latent_dim_pi = pi_params[-1][0].shape[1] if n_pi else last_shared
    latent_dim_vf = vf_params[-1][0].shape[1] if n_vf else last_shared

    # Lane-dense padded dims.
    feat_p = _round_up(feat, _LANE)
    pi_p = _round_up(latent_dim_pi, _LANE)
    vf_p = _round_up(latent_dim_vf, _LANE)

    # Batch tiling: multiple of sublane packing; tiles of <=512 rows, weights
    # stay pinned in VMEM across tiles.
    sub = _SUBLANE_BF16 if use_bf16 else _SUBLANE_F32
    if batch_tile is None:
        batch_tile = min(512, _round_up(B, sub))
    batch_tile = _round_up(batch_tile, sub)
    B_p = _round_up(B, batch_tile)
    grid = (B_p // batch_tile,)

    # Zero-pad inputs / parameters (exact: tanh(0)=0 and padded rows are 0).
    x_p = _pad2d(features.astype(jnp.float32), B_p, feat_p)
    padded_ws, padded_bs = [], []
    for (W, b) in all_params:
        din, dout = W.shape
        padded_ws.append(_pad2d(W.astype(jnp.float32), _round_up(din, _LANE),
                                _round_up(dout, _LANE)))
        padded_bs.append(_pad2d(b.astype(jnp.float32).reshape(1, dout), 1,
                                _round_up(dout, _LANE)))

    # BlockSpecs: x / outputs tiled over batch, weights & biases pinned.
    in_specs = [pl.BlockSpec((batch_tile, feat_p), lambda i: (i, 0))]
    for wp in padded_ws:
        in_specs.append(pl.BlockSpec(wp.shape, lambda i: (0, 0)))
    for bp in padded_bs:
        in_specs.append(pl.BlockSpec(bp.shape, lambda i: (0, 0)))
    out_specs = [
        pl.BlockSpec((batch_tile, pi_p), lambda i: (i, 0)),
        pl.BlockSpec((batch_tile, vf_p), lambda i: (i, 0)),
    ]
    out_shape = [
        jax.ShapeDtypeStruct((B_p, pi_p), jnp.float32),
        jax.ShapeDtypeStruct((B_p, vf_p), jnp.float32),
    ]

    # VMEM budget derived from the padded footprint (2x for double buffering),
    # clamped so it is valid on v7x's 64 MiB physical VMEM.
    bytes_resident = (
        batch_tile * feat_p * 4
        + sum(int(w.size) * 4 for w in padded_ws)
        + sum(int(b.size) * 4 for b in padded_bs)
        + batch_tile * (pi_p + vf_p) * 4
    )
    vmem_limit = int(min(max(2 * bytes_resident + (4 << 20), 16 << 20), 64 << 20))

    kernel = functools.partial(
        _fused_mlp_kernel, n_shared=n_shared, n_pi=n_pi, n_vf=n_vf,
        use_bf16=use_bf16,
    )
    pi_out, vf_out = pl.pallas_call(
        kernel,
        out_shape=out_shape,
        grid_spec=pltpu.PrefetchScalarGridSpec(
            num_scalar_prefetch=0,
            grid=grid,
            in_specs=in_specs,
            out_specs=out_specs,
        ),
        compiler_params=pltpu.CompilerParams(
            dimension_semantics=("parallel",),
            vmem_limit_bytes=vmem_limit,
        ),
    )(x_p, *padded_ws, *padded_bs)

    latent_pi = pi_out[:B, :latent_dim_pi]
    latent_vf = vf_out[:B, :latent_dim_vf]
    return latent_pi, latent_vf


# ---------------------------------------------------------------------------
# Parameter construction (deterministic, synthetic) matching MlpExtractor.
# ---------------------------------------------------------------------------
def build_mlp_extractor_params(key, feature_dim, net_arch):
    """Returns (shared_params, pi_params, vf_params): lists of (W, b)."""
    shared_sizes = []
    pi_sizes, vf_sizes = [], []
    for layer in net_arch:
        if isinstance(layer, int):
            shared_sizes.append(layer)
        else:
            pi_sizes = layer.get("pi", [])
            vf_sizes = layer.get("vf", [])
            break

    def make_stack(key, in_dim, sizes):
        params = []
        last = in_dim
        for size in sizes:
            key, kw, kb = jax.random.split(key, 3)
            bound = 1.0 / jnp.sqrt(jnp.float32(last))
            W = jax.random.uniform(kw, (last, size), jnp.float32, -bound, bound)
            bvec = jax.random.uniform(kb, (size,), jnp.float32, -bound, bound)
            params.append((W, bvec))
            last = size
        return key, params, last

    key, shared_params, last_shared = make_stack(key, feature_dim, shared_sizes)
    key, pi_params, _ = make_stack(key, last_shared, pi_sizes)
    key, vf_params, _ = make_stack(key, last_shared, vf_sizes)
    return shared_params, pi_params, vf_params


# ---------------------------------------------------------------------------
# Reference (plain JAX) for correctness checks.
# ---------------------------------------------------------------------------
def mlp_extractor_forward_ref(features, shared_params, pi_params, vf_params):
    x = features
    for W, b in shared_params:
        x = jnp.tanh(x @ W + b)
    pi = x
    for W, b in pi_params:
        pi = jnp.tanh(pi @ W + b)
    vf = x
    for W, b in vf_params:
        vf = jnp.tanh(vf @ W + b)
    return pi, vf


if __name__ == "__main__":
    # Small config: feature_dim=16, one shared layer of 32,
    # then pi=[32] and vf=[32] non-shared layers, Tanh activation (SB3 default).
    feature_dim = 16
    net_arch = [32, {"pi": [32], "vf": [32]}]
    batch = 8

    key = jax.random.PRNGKey(0)
    key, kfeat = jax.random.split(key)
    features = jax.random.normal(kfeat, (batch, feature_dim), jnp.float32)

    shared_params, pi_params, vf_params = build_mlp_extractor_params(
        key, feature_dim, net_arch
    )

    # --- f32 path (default), single batch tile -----------------------------
    latent_pi, latent_vf = mlp_extractor_forward(
        features, shared_params, pi_params, vf_params
    )
    latent_pi = jax.block_until_ready(latent_pi)
    latent_vf = jax.block_until_ready(latent_vf)

    ref_pi, ref_vf = mlp_extractor_forward_ref(
        features, shared_params, pi_params, vf_params
    )
    assert latent_pi.shape == (batch, 32)
    assert latent_vf.shape == (batch, 32)
    assert jnp.allclose(latent_pi, ref_pi, atol=1e-5, rtol=1e-5)
    assert jnp.allclose(latent_vf, ref_vf, atol=1e-5, rtol=1e-5)

    # --- larger batch: exercise the batch grid (3 tiles) + bf16 MXU path ----
    features2 = jax.random.normal(jax.random.PRNGKey(1), (40, feature_dim),
                                  jnp.float32)
    pi2, vf2 = mlp_extractor_forward(
        features2, shared_params, pi_params, vf_params,
        batch_tile=16, use_bf16=True,
    )
    pi2 = jax.block_until_ready(pi2)
    vf2 = jax.block_until_ready(vf2)
    rpi2, rvf2 = mlp_extractor_forward_ref(
        features2, shared_params, pi_params, vf_params
    )
    assert pi2.shape == (40, 32) and vf2.shape == (40, 32)
    assert jnp.allclose(pi2, rpi2, atol=3e-2, rtol=0.0)
    assert jnp.allclose(vf2, rvf2, atol=3e-2, rtol=0.0)

    print("KERNEL_OK")
</pallas_src>

<mosaic_0001>
module attributes {stable_mosaic.version = 11 : i64} {
  func.func @_fused_mlp_kernel(%arg0: i32, %arg1: memref<8x128xf32, #tpu.memory_space<vmem>>, %arg2: memref<128x128xf32, #tpu.memory_space<vmem>>, %arg3: memref<128x128xf32, #tpu.memory_space<vmem>>, %arg4: memref<128x128xf32, #tpu.memory_space<vmem>>, %arg5: memref<1x128xf32, #tpu.memory_space<vmem>>, %arg6: memref<1x128xf32, #tpu.memory_space<vmem>>, %arg7: memref<1x128xf32, #tpu.memory_space<vmem>>, %arg8: memref<8x128xf32, #tpu.memory_space<vmem>>, %arg9: memref<8x128xf32, #tpu.memory_space<vmem>>) attributes {dimension_semantics = [#tpu.dimension_semantics<parallel>], iteration_bounds = array<i64: 1>, scalar_prefetch = 0 : i64, scratch_operands = 0 : i64, tpu.core_type = #tpu.core_type<tc>, window_params = [{transform_indices = @transform_0, window_bounds = array<i64: 8, 128>}, {pipeline_mode = #tpu.pipeline_mode<synchronous>, transform_indices = @transform_1, window_bounds = array<i64: 128, 128>}, {pipeline_mode = #tpu.pipeline_mode<synchronous>, transform_indices = @transform_2, window_bounds = array<i64: 128, 128>}, {pipeline_mode = #tpu.pipeline_mode<synchronous>, transform_indices = @transform_3, window_bounds = array<i64: 128, 128>}, {pipeline_mode = #tpu.pipeline_mode<synchronous>, transform_indices = @transform_4, window_bounds = array<i64: 1, 128>}, {pipeline_mode = #tpu.pipeline_mode<synchronous>, transform_indices = @transform_5, window_bounds = array<i64: 1, 128>}, {pipeline_mode = #tpu.pipeline_mode<synchronous>, transform_indices = @transform_6, window_bounds = array<i64: 1, 128>}, {transform_indices = @transform_7, window_bounds = array<i64: 8, 128>}, {transform_indices = @transform_8, window_bounds = array<i64: 8, 128>}]} {
    %c0 = arith.constant 0 : index
    %c0_0 = arith.constant 0 : index
    %0 = vector.load %arg1[%c0, %c0_0] : memref<8x128xf32, #tpu.memory_space<vmem>>, vector<8x128xf32>
    %c0_1 = arith.constant 0 : index
    %c0_2 = arith.constant 0 : index
    %1 = vector.load %arg2[%c0_1, %c0_2] : memref<128x128xf32, #tpu.memory_space<vmem>>, vector<128x128xf32>
    %cst = arith.constant dense<0.000000e+00> : vector<8x128xf32>
    %2 = tpu.matmul %0, %1, %cst {dimension_numbers = #tpu.dot_dimension_numbers<[1], [0], [0], [1], [0, 0, 1, 1], [], []>} : vector<8x128xf32>, vector<128x128xf32>, vector<8x128xf32> -> vector<8x128xf32>
    %c0_3 = arith.constant 0 : index
    %c0_4 = arith.constant 0 : index
    %3 = vector.load %arg5[%c0_3, %c0_4] : memref<1x128xf32, #tpu.memory_space<vmem>>, vector<1x128xf32>
    %4 = vector.broadcast %3 : vector<1x128xf32> to vector<8x128xf32>
    %5 = arith.addf %2, %4 : vector<8x128xf32>
    %6 = math.tanh %5 : vector<8x128xf32>
    %c0_5 = arith.constant 0 : index
    %c0_6 = arith.constant 0 : index
    %7 = vector.load %arg3[%c0_5, %c0_6] : memref<128x128xf32, #tpu.memory_space<vmem>>, vector<128x128xf32>
    %cst_7 = arith.constant dense<0.000000e+00> : vector<8x128xf32>
    %8 = tpu.matmul %6, %7, %cst_7 {dimension_numbers = #tpu.dot_dimension_numbers<[1], [0], [0], [1], [0, 0, 1, 1], [], []>} : vector<8x128xf32>, vector<128x128xf32>, vector<8x128xf32> -> vector<8x128xf32>
    %c0_8 = arith.constant 0 : index
    %c0_9 = arith.constant 0 : index
    %9 = vector.load %arg6[%c0_8, %c0_9] : memref<1x128xf32, #tpu.memory_space<vmem>>, vector<1x128xf32>
    %10 = vector.broadcast %9 : vector<1x128xf32> to vector<8x128xf32>
    %11 = arith.addf %8, %10 : vector<8x128xf32>
    %12 = math.tanh %11 : vector<8x128xf32>
    %c0_10 = arith.constant 0 : index
    %c0_11 = arith.constant 0 : index
    %13 = vector.load %arg4[%c0_10, %c0_11] : memref<128x128xf32, #tpu.memory_space<vmem>>, vector<128x128xf32>
    %cst_12 = arith.constant dense<0.000000e+00> : vector<8x128xf32>
    %14 = tpu.matmul %6, %13, %cst_12 {dimension_numbers = #tpu.dot_dimension_numbers<[1], [0], [0], [1], [0, 0, 1, 1], [], []>} : vector<8x128xf32>, vector<128x128xf32>, vector<8x128xf32> -> vector<8x128xf32>
    %c0_13 = arith.constant 0 : index
    %c0_14 = arith.constant 0 : index
    %15 = vector.load %arg7[%c0_13, %c0_14] : memref<1x128xf32, #tpu.memory_space<vmem>>, vector<1x128xf32>
    %16 = vector.broadcast %15 : vector<1x128xf32> to vector<8x128xf32>
    %17 = arith.addf %14, %16 : vector<8x128xf32>
    %18 = math.tanh %17 : vector<8x128xf32>
    %c0_15 = arith.constant 0 : index
    %c0_16 = arith.constant 0 : index
    %19 = vector.load %arg8[%c0_15, %c0_16] : memref<8x128xf32, #tpu.memory_space<vmem>>, vector<8x128xf32>
    tpu.vector_store %arg8[%c0_15, %c0_16], %12 {strides = array<i32>} : memref<8x128xf32, #tpu.memory_space<vmem>>, vector<8x128xf32>,
    %c0_17 = arith.constant 0 : index
    %c0_18 = arith.constant 0 : index
    %20 = vector.load %arg9[%c0_17, %c0_18] : memref<8x128xf32, #tpu.memory_space<vmem>>, vector<8x128xf32>
    tpu.vector_store %arg9[%c0_17, %c0_18], %18 {strides = array<i32>} : memref<8x128xf32, #tpu.memory_space<vmem>>, vector<8x128xf32>,
    return
  }
  func.func @transform_0(%arg0: i32) -> (i32, i32) {
    %c0_i32 = arith.constant 0 : i32
    %c0_i32_0 = arith.constant 0 : i32
    return %arg0, %c0_i32 : i32, i32
  }
  func.func @transform_1(%arg0: i32) -> (i32, i32) {
    %c0_i32 = arith.constant 0 : i32
    %c0_i32_0 = arith.constant 0 : i32
    %c0_i32_1 = arith.constant 0 : i32
    return %c0_i32, %c0_i32_0 : i32, i32
  }
  func.func @transform_2(%arg0: i32) -> (i32, i32) {
    %c0_i32 = arith.constant 0 : i32
    %c0_i32_0 = arith.constant 0 : i32
    %c0_i32_1 = arith.constant 0 : i32
    return %c0_i32, %c0_i32_0 : i32, i32
  }
  func.func @transform_3(%arg0: i32) -> (i32, i32) {
    %c0_i32 = arith.constant 0 : i32
    %c0_i32_0 = arith.constant 0 : i32
    %c0_i32_1 = arith.constant 0 : i32
    return %c0_i32, %c0_i32_0 : i32, i32
  }
  func.func @transform_4(%arg0: i32) -> (i32, i32) {
    %c0_i32 = arith.constant 0 : i32
    %c0_i32_0 = arith.constant 0 : i32
    %c0_i32_1 = arith.constant 0 : i32
    return %c0_i32, %c0_i32_0 : i32, i32
  }
  func.func @transform_5(%arg0: i32) -> (i32, i32) {
    %c0_i32 = arith.constant 0 : i32
    %c0_i32_0 = arith.constant 0 : i32
    %c0_i32_1 = arith.constant 0 : i32
    return %c0_i32, %c0_i32_0 : i32, i32
  }
  func.func @transform_6(%arg0: i32) -> (i32, i32) {
    %c0_i32 = arith.constant 0 : i32
    %c0_i32_0 = arith.constant 0 : i32
    %c0_i32_1 = arith.constant 0 : i32
    return %c0_i32, %c0_i32_0 : i32, i32
  }
  func.func @transform_7(%arg0: i32) -> (i32, i32) {
    %c0_i32 = arith.constant 0 : i32
    %c0_i32_0 = arith.constant 0 : i32
    return %arg0, %c0_i32 : i32, i32
  }
  func.func @transform_8(%arg0: i32) -> (i32, i32) {
    %c0_i32 = arith.constant 0 : i32
    %c0_i32_0 = arith.constant 0 : i32
    return %arg0, %c0_i32 : i32, i32
  }
}

</mosaic_0001>

<bundles_post_ra>
// kernel: tpu_custom_call.1
= control target key start
LH: loop header
LB: loop body
LE: loop exit
PB: predicated region body
PF: predicated region fallthrough
CT: control target
= control target key end

     0   :  { %14 = vsyncpa [#allocation3], 0  ;;  %s972_s0 = inlined_call_operand.hbm [shape: f32[8,128], index: 0, kind: input, shape index: {}]   ;;  %s973_s1 = inlined_call_operand.hbm [shape: f32[128,128], index: 1, kind: input, shape index: {}]   ;;  %s974_s2 = inlined_call_operand.hbm [shape: f32[128,128], index: 2, kind: input, shape index: {}]   ;;  %s975_s3 = inlined_call_operand.hbm [shape: f32[128,128], index: 3, kind: input, shape index: {}]   ;;  %s976_s4 = inlined_call_operand.vmem [shape: f32[1,128], index: 4, kind: input, shape index: {}]   ;;  %s977_s5 = inlined_call_operand.vmem [shape: f32[1,128], index: 5, kind: input, shape index: {}]   ;;  %s978_s6 = inlined_call_operand.vmem [shape: f32[1,128], index: 6, kind: input, shape index: {}]   ;;  %s979_s7 = inlined_call_operand.hbm [shape: f32[8,128], index: 7, kind: output, shape index: {0}]   ;;  %s980_s8 = inlined_call_operand.hbm [shape: f32[8,128], index: 8, kind: output, shape index: {1}]  }
   0x1   :  { %15 = vsyncpa [#allocation6], 0 }
   0x2   :  { %16 = vsyncpa [#allocation9], 0 }
   0x3   :  { %17 = vsyncpa [#allocation4], 0 }
   0x4   :  { %18 = vsyncpa [#allocation12], 0  ;;  %s789_s27 = smov [#allocation5]   ;;  %s647_s9 = scalar_lea.hbm %s973_s1, 2048 }
   0x5   :  { %s34_s28 = sshll.u32 %s789_s27, 4  ;;  %p648_p0 = scmp.ne.s32.totalorder %s973_s1, %s647_s9  ;;  %s35_s28 = int_to_ptr.vmem [resolvable:$true] %s34_s28 }
   0x6   :  { %p651_p1 = scmp.lt.u32.totalorder %s647_s9, %s973_s1 }
   0x8   :  { %p653_p2 = pnand %p651_p1, %p648_p0 }
   0xa   :  { %656 = shalt.err (!%p653_p2)
}
   0xb   :  { %s657_s14 = scalar_lea.vmem %s35_s28, 2048  ;;  %p662_p4 = scmp.lt.s32.totalorder %s35_s28, %s35_s28 }
   0xc   :  { %p658_p3 = scmp.ne.s32.totalorder %s35_s28, %s657_s14  ;;  %p663_p5 = scmp.lt.s32.totalorder %s657_s14, %s657_s14 }
   0xe   :  { %p664_p6 = por %p663_p5, %p662_p4 }
  0x10   :  { %p665_p7 = pnand %p664_p6, %p658_p3 }
  0x12   :  { %668 = shalt.err (!%p665_p7)
}
  0x13   :  { %s790_s15 = smov 128   ;;  %s791_s16 = smov 8  }
  0x14   :  { %40 = dma.hbm_to_vmem [thread:$0]  %s973_s1, 2048, %s35_s28, [#allocation6], %s790_s15, %s790_s15, %s791_s16  }
  0x15   :  { %s792_s19 = smov [#allocation2]   ;;  %s793_s21 = smov [#allocation7]  }
  0x16   :  { %s25_s20 = sshll.u32 %s792_s19, 4  ;;  %s46_s22 = sshll.u32 %s793_s21, 4  ;;  %s26_s20 = int_to_ptr.vmem [resolvable:$true] %s25_s20  ;;  %s47_s22 = int_to_ptr.vmem [resolvable:$true] %s46_s22 }
  0x17   :  { %s669_s25 = scalar_lea.hbm %s972_s0, 128 }
  0x18   :  { %p670_p8 = scmp.ne.s32.totalorder %s972_s0, %s669_s25  ;;  %p673_p9 = scmp.lt.u32.totalorder %s669_s25, %s972_s0 }
  0x1a   :  { %p675_p10 = pnand %p673_p9, %p670_p8 }
  0x1c   :  { %678 = shalt.err (!%p675_p10)
}
  0x1d   :  { %s679_s1 = scalar_lea.vmem %s26_s20, 128  ;;  %p684_p12 = scmp.lt.s32.totalorder %s26_s20, %s26_s20 }
  0x1e   :  { %p680_p11 = scmp.ne.s32.totalorder %s26_s20, %s679_s1  ;;  %p685_p13 = scmp.lt.s32.totalorder %s679_s1, %s679_s1 }
  0x20   :  { %p686_p0 = por %p685_p13, %p684_p12 }
  0x22   :  { %p687_p1 = pnand %p686_p0, %p680_p11 }
  0x24   :  { %690 = shalt.err (!%p687_p1)
}
  0x25   :  { %28 = dma.hbm_to_vmem [thread:$0]  %s972_s0, 128, %s26_s20, [#allocation3]  }
  0x26   :  { %s691_s12 = scalar_lea.hbm %s974_s2, 2048 }
  0x27   :  { %p692_p2 = scmp.ne.s32.totalorder %s974_s2, %s691_s12  ;;  %p695_p3 = scmp.lt.u32.totalorder %s691_s12, %s974_s2 }
  0x29   :  { %p697_p4 = pnand %p695_p3, %p692_p2 }
  0x2b   :  { %700 = shalt.err (!%p697_p4)
}
  0x2c   :  { %s701_s19 = scalar_lea.vmem %s47_s22, 2048  ;;  %p706_p6 = scmp.lt.s32.totalorder %s47_s22, %s47_s22 }
  0x2d   :  { %p702_p5 = scmp.ne.s32.totalorder %s47_s22, %s701_s19  ;;  %p707_p7 = scmp.lt.s32.totalorder %s701_s19, %s701_s19 }
  0x2f   :  { %p708_p8 = por %p707_p7, %p706_p6 }
  0x31   :  { %p709_p9 = pnand %p708_p8, %p702_p5 }
  0x33   :  { %712 = shalt.err (!%p709_p9)
}
  0x34   :  { %52 = dma.hbm_to_vmem [thread:$0]  %s974_s2, 2048, %s47_s22, [#allocation6], %s790_s15, %s790_s15, %s791_s16  }
  0x35   :  { %s794_s21 = smov [#allocation8]   ;;  %s713_s26 = scalar_lea.hbm %s975_s3, 2048 }
  0x36   :  { %s58_s23 = sshll.u32 %s794_s21, 4  ;;  %p714_p10 = scmp.ne.s32.totalorder %s975_s3, %s713_s26  ;;  %s59_s23 = int_to_ptr.vmem [resolvable:$true] %s58_s23 }
  0x37   :  { %p717_p11 = scmp.lt.u32.totalorder %s713_s26, %s975_s3 }
  0x39   :  { %p719_p12 = pnand %p717_p11, %p714_p10 }
  0x3b   :  { %722 = shalt.err (!%p719_p12)
}
  0x3c   :  { %s723_s28 = scalar_lea.vmem %s59_s23, 2048  ;;  %p728_p0 = scmp.lt.s32.totalorder %s59_s23, %s59_s23 }
  0x3d   :  { %p724_p13 = scmp.ne.s32.totalorder %s59_s23, %s723_s28  ;;  %p729_p1 = scmp.lt.s32.totalorder %s723_s28, %s723_s28 }
  0x3f   :  { %p730_p2 = por %p729_p1, %p728_p0 }
  0x41   :  { %p731_p3 = pnand %p730_p2, %p724_p13 }
  0x43   :  { %734 = shalt.err (!%p731_p3)
}
  0x44   :  { %64 = dma.hbm_to_vmem [thread:$0]  %s975_s3, 2048, %s59_s23, [#allocation9], %s790_s15, %s790_s15, %s791_s16  }
  0x45   :  { %779 = dma.done.wait [#allocation3], 128  }
  0x46   :  { %780 = vsyncadd [#allocation3], 4294967168 }
  0x47   :  { %781 = dma.done.wait [#allocation6], 4096  }
  0x48   :  { %782 = vsyncadd [#allocation6], 4294963200 }
  0x49   :  { %783 = dma.done.wait [#allocation9], 2048  }
  0x4a   :  { %784 = vsyncadd [#allocation9], 4294965248  ;;  %v795_v0 = vmov 0.0|0.0   ;;  %vm796_vm0 = vmmov 0   ;;  %v797_v1 = vmov 0.0   ;;  %v84_v2 = vld [vmem:[#allocation5] sm:$0xff] }
  0x4b   :  { %558 = vmatprep.subr.bf16.mxu0 %v795_v0  ;;  %485 = vmatprep.mubr.msk.f32.mxu0 %vm796_vm0, %v797_v1  ;;  %v85_v3 = vld [vmem:[#allocation5 + $0x8] sm:$0xff]  ;;  %v86_v4 = vld [vmem:[#allocation5 + $0x10] sm:$0xff]  ;;  %v87_v6 = vld [vmem:[#allocation5 + $0x18] sm:$0xff]  ;;  %s799_s13 = smov [#allocation11]  }
  0x4c   :  { %582 = vmatprep.subr.bf16.mxu1 %v795_v0  ;;  %520 = vmatprep.mubr.msk.f32.mxu1 %vm796_vm0, %v797_v1  ;;  %v559_v5 = vpack.c.bf16 %v85_v3, %v84_v2  ;;  %v562_v7 = vpack.c.bf16 %v87_v6, %v86_v4  ;;  %v88_v8 = vld [vmem:[#allocation5 + $0x20] sm:$0xff]  ;;  %v89_v9 = vld [vmem:[#allocation5 + $0x28] sm:$0xff]  ;;  %v180_v14 = vld [vmem:[#allocation7 + $0x10] sm:$0xff]  ;;  %s384_s14 = sshll.u32 %s799_s13, 4  ;;  %s941_s14 = int_to_ptr.vmem [resolvable:$true] %s384_s14 }
  0x4d   :  { %v178_v10 = vld [vmem:[#allocation7] sm:$0xff]  ;;  %v179_v11 = vld [vmem:[#allocation7 + $0x8] sm:$0xff]  ;;  %v565_v12 = vpack.c.bf16 %v89_v9, %v88_v8  ;;  %v181_v15 = vld [vmem:[#allocation7 + $0x18] sm:$0xff] }
  0x4e   :  { %560 = vmatpush3.bf16.msra.mxu0 %v559_v5  ;;  %v583_v13 = vpack.c.bf16 %v179_v11, %v178_v10  ;;  %v90_v16 = vld [vmem:[#allocation5 + $0x30] sm:$0xff]  ;;  %v91_v17 = vld [vmem:[#allocation5 + $0x38] sm:$0xff]  ;;  %v586_v18 = vpack.c.bf16 %v181_v15, %v180_v14  ;;  %v182_v19 = vld [vmem:[#allocation7 + $0x20] sm:$0xff] }
  0x4f   :  { %561 = vmatprep.subr.bf16.mxu0 %v795_v0  ;;  %v183_v20 = vld [vmem:[#allocation7 + $0x28] sm:$0xff]  ;;  %v568_v21 = vpack.c.bf16 %v91_v17, %v90_v16  ;;  %v92_v22 = vld [vmem:[#allocation5 + $0x40] sm:$0xff]  ;;  %v184_v25 = vld [vmem:[#allocation7 + $0x30] sm:$0xff] }
  0x50   :  { %584 = vmatpush3.bf16.msra.mxu1 %v583_v13  ;;  %v93_v23 = vld [vmem:[#allocation5 + $0x48] sm:$0xff]  ;;  %v589_v24 = vpack.c.bf16 %v183_v20, %v182_v19  ;;  %v185_v26 = vld [vmem:[#allocation7 + $0x38] sm:$0xff]  ;;  %v94_v28 = vld [vmem:[#allocation5 + $0x50] sm:$0xff] }
  0x51   :  { %585 = vmatprep.subr.bf16.mxu1 %v795_v0  ;;  %v571_v27 = vpack.c.bf16 %v93_v23, %v92_v22  ;;  %v95_v29 = vld [vmem:[#allocation5 + $0x58] sm:$0xff]  ;;  %v592_v30 = vpack.c.bf16 %v185_v26, %v184_v25  ;;  %v186_v31 = vld [vmem:[#allocation7 + $0x40] sm:$0xff]  ;;  %v187_v32 = vld [vmem:[#allocation7 + $0x48] sm:$0xff] }
  0x52   :  { %563 = vmatpush3.bf16.msra.mxu0 %v562_v7  ;;  %v574_v33 = vpack.c.bf16 %v95_v29, %v94_v28  ;;  %v96_v34 = vld [vmem:[#allocation5 + $0x60] sm:$0xff]  ;;  %v97_v35 = vld [vmem:[#allocation5 + $0x68] sm:$0xff]  ;;  %v595_v36 = vpack.c.bf16 %v187_v32, %v186_v31  ;;  %v98_v38 = vld [vmem:[#allocation5 + $0x70] sm:$0xff] }
  0x53   :  { %564 = vmatprep.subr.bf16.mxu0 %v795_v0  ;;  %v577_v37 = vpack.c.bf16 %v97_v35, %v96_v34  ;;  %v99_v39 = vld [vmem:[#allocation5 + $0x78] sm:$0xff]  ;;  %v272_v41 = vld [vmem:[#allocation8] sm:$0xff]  ;;  %v273_v42 = vld [vmem:[#allocation8 + $0x8] sm:$0xff] }
  0x54   :  { %587 = vmatpush3.bf16.msra.mxu1 %v586_v18  ;;  %v580_v40 = vpack.c.bf16 %v99_v39, %v98_v38  ;;  %v83_v43 = vld [vmem:[#allocation2] sm:$0xff]  ;;  %v607_v44 = vpack.c.bf16 %v273_v42, %v272_v41  ;;  %v274_v45 = vld [vmem:[#allocation8 + $0x10] sm:$0xff]  ;;  %v276_v48 = vld [vmem:[#allocation8 + $0x20] sm:$0xff] }
  0x55   :  { %588 = vmatprep.subr.bf16.mxu1 %v795_v0  ;;  %v275_v46 = vld [vmem:[#allocation8 + $0x18] sm:$0xff]  ;;  %v277_v49 = vld [vmem:[#allocation8 + $0x28] sm:$0xff]  ;;  %v278_v51 = vld [vmem:[#allocation8 + $0x30] sm:$0xff] }
  0x56   :  { %566 = vmatpush3.bf16.msra.mxu0 %v565_v12  ;;  %v610_v47 = vpack.c.bf16 %v275_v46, %v274_v45  ;;  %v613_v50 = vpack.c.bf16 %v277_v49, %v276_v48  ;;  %v279_v52 = vld [vmem:[#allocation8 + $0x38] sm:$0xff]  ;;  %v280_v54 = vld [vmem:[#allocation8 + $0x40] sm:$0xff]  ;;  %v281_v55 = vld [vmem:[#allocation8 + $0x48] sm:$0xff] }
  0x57   :  { %567 = vmatprep.subr.bf16.mxu0 %v795_v0  ;;  %v616_v53 = vpack.c.bf16 %v279_v52, %v278_v51  ;;  %v619_v56 = vpack.c.bf16 %v281_v55, %v280_v54  ;;  %v188_v57 = vld [vmem:[#allocation7 + $0x50] sm:$0xff]  ;;  %v189_v58 = vld [vmem:[#allocation7 + $0x58] sm:$0xff]  ;;  %v190_v63 = vld [vmem:[#allocation7 + $0x60] sm:$0xff] }
  0x58   :  { %590 = vmatpush3.bf16.msra.mxu1 %v589_v24  ;;  %v282_v59 = vld [vmem:[#allocation8 + $0x50] sm:$0xff]  ;;  %v598_v60 = vpack.c.bf16 %v189_v58, %v188_v57  ;;  %v283_v61 = vld [vmem:[#allocation8 + $0x58] sm:$0xff]  ;;  %v284_v2 = vld [vmem:[#allocation8 + $0x60] sm:$0xff] }
  0x59   :  { %591 = vmatprep.subr.bf16.mxu1 %v795_v0  ;;  %v622_v62 = vpack.c.bf16 %v283_v61, %v282_v59  ;;  %v285_v4 = vld [vmem:[#allocation8 + $0x68] sm:$0xff]  ;;  %v192_v5 = vld [vmem:[#allocation7 + $0x70] sm:$0xff]  ;;  %v193_v6 = vld [vmem:[#allocation7 + $0x78] sm:$0xff] }
  0x5a   :  { %569 = vmatpush3.bf16.msra.mxu0 %v568_v21  ;;  %v625_v7 = vpack.c.bf16 %v285_v4, %v284_v2  ;;  %v286_v8 = vld [vmem:[#allocation8 + $0x70] sm:$0xff]  ;;  %v287_v9 = vld [vmem:[#allocation8 + $0x78] sm:$0xff]  ;;  %v604_v10 = vpack.c.bf16 %v193_v6, %v192_v5 }
  0x5b   :  { %570 = vmatprep.subr.bf16.mxu0 %v795_v0  ;;  %v628_v11 = vpack.c.bf16 %v287_v9, %v286_v8  ;;  %v399_v12 = vld [vmem:[%s976_s4] ss:$0 sm:$0xff]  ;;  %s798_s4 = smov [#allocation10]  }
  0x5c   :  { %593 = vmatpush3.bf16.msra.mxu1 %v592_v30  ;;  %v400_v17 = vld [vmem:[%s977_s5] ss:$0 sm:$0xff]  ;;  %s374_s12 = sshll.u32 %s798_s4, 4  ;;  %s375_s12 = int_to_ptr.vmem [resolvable:$true] %s374_s12 }
  0x5d   :  { %594 = vmatprep.subr.bf16.mxu1 %v795_v0  ;;  %s735_s5 = scalar_lea.vmem %s375_s12, 128  ;;  %p740_p5 = scmp.lt.s32.totalorder %s375_s12, %s375_s12 }
  0x5e   :  { %572 = vmatpush3.bf16.msra.mxu0 %v571_v27  ;;  %p736_p4 = scmp.ne.s32.totalorder %s375_s12, %s735_s5  ;;  %p741_p6 = scmp.lt.s32.totalorder %s735_s5, %s735_s5 }
  0x5f   :  { %573 = vmatprep.subr.bf16.mxu0 %v795_v0 }
  0x60   :  { %596 = vmatpush3.bf16.msra.mxu1 %v595_v36  ;;  %p742_p7 = por %p741_p6, %p740_p5 }
  0x61   :  { %597 = vmatprep.subr.bf16.mxu1 %v795_v0 }
  0x62   :  { %575 = vmatpush3.bf16.msra.mxu0 %v574_v33  ;;  %p743_p8 = pnand %p742_p7, %p736_p4 }
  0x63   :  { %576 = vmatprep.subr.bf16.mxu0 %v795_v0 }
  0x64   :  { %599 = vmatpush3.bf16.msra.mxu1 %v598_v60 }
  0x65   :  { %600 = vmatprep.subr.bf16.mxu1 %v795_v0 }
  0x66   :  { %578 = vmatpush3.bf16.msra.mxu0 %v577_v37 }
  0x67   :  { %579 = vmatprep.subr.bf16.mxu0 %v795_v0 }
  0x6a   :  { %581 = vmatpush3.bf16.msra.mxu0 %v580_v40 }
  0x6b   :  { %606 = vmatprep.subr.bf16.mxu0 %v795_v0 }
  0x6d   :  { %486 = vmatmul.mubr.f32.vlgmr.msra.gmra.mrb[0].mxu0 %v83_v43 }
  0x6e   :  { %608 = vmatpush3.bf16.msra.mxu0 %v607_v44  ;;  %555 = vmatprep.mubr.msk.f32.mxu0 %vm796_vm0, %v797_v1  ;;  %v191_v1 = vld [vmem:[#allocation7 + $0x68] sm:$0xff] }
  0x6f   :  { %609 = vmatprep.subr.bf16.mxu0 %v795_v0  ;;  %v601_v3 = vpack.c.bf16 %v191_v1, %v190_v63 }
  0x71   :  { %602 = vmatpush3.bf16.msra.mxu1 %v601_v3 }
  0x72   :  { %611 = vmatpush3.bf16.msra.mxu0 %v610_v47  ;;  %603 = vmatprep.subr.bf16.mxu1 %v795_v0 }
  0x73   :  { %612 = vmatprep.subr.bf16.mxu0 %v795_v0 }
  0x75   :  { %605 = vmatpush3.bf16.msra.mxu1 %v604_v10 }
  0x76   :  { %614 = vmatpush3.bf16.msra.mxu0 %v613_v50 }
  0x77   :  { %615 = vmatprep.subr.bf16.mxu0 %v795_v0 }
  0x7a   :  { %617 = vmatpush3.bf16.msra.mxu0 %v616_v53 }
  0x7b   :  { %618 = vmatprep.subr.bf16.mxu0 %v795_v0 }
  0x7e   :  { %620 = vmatpush3.bf16.msra.mxu0 %v619_v56 }
  0x7f   :  { %621 = vmatprep.subr.bf16.mxu0 %v795_v0 }
  0x82   :  { %623 = vmatpush3.bf16.msra.mxu0 %v622_v62 }
  0x83   :  { %624 = vmatprep.subr.bf16.mxu0 %v795_v0 }
  0x86   :  { %626 = vmatpush3.bf16.msra.mxu0 %v625_v7 }
  0x87   :  { %627 = vmatprep.subr.bf16.mxu0 %v795_v0  ;;  %v401_v0 = vld [vmem:[%s978_s6] ss:$0 sm:$0xff] }
  0x8a   :  { %629 = vmatpush3.bf16.msra.mxu0 %v628_v11 }
 0x140   :  { %v173_v13 = vpop.f32.mrb[0].mxu0 }
 0x141   :  { %v174_v14 = vadd.f32 %v399_v12, %v173_v13  ;;  %v487_v15 = vpop.f32.mrb[1].mxu0 }
 0x143   :  { %641 = vtanh.f32 %v174_v14 }
 0x14d   :  { %v642_v16 = vpop.eup %641 }
 0x14e   :  { %521 = vmatmul.mubr.f32.vlgmr.msra.gmra.mrb[0].mxu1 %v642_v16  ;;  %556 = vmatmul.mubr.f32.vlgmr.msra.gmra.mrb[2].mxu0 %v642_v16 }
 0x221   :  { %v267_v18 = vpop.f32.mrb[0].mxu1  ;;  %v361_v19 = vpop.f32.mrb[2].mxu0 }
 0x222   :  { %v268_v20 = vadd.f32 %v400_v17, %v267_v18  ;;  %v362_v21 = vadd.f32 %v401_v0, %v361_v19  ;;  %v522_v22 = vpop.f32.mrb[1].mxu1  ;;  %v557_v23 = vpop.f32.mrb[3].mxu0 }
 0x224   :  { %643 = vtanh.f32 %v268_v20 }
 0x225   :  { %645 = vtanh.f32 %v362_v21 }
 0x22e   :  { %v644_v24 = vpop.eup %643 }
 0x22f   :  { %v646_v25 = vpop.eup %645  ;;  %366 = vst [vmem:[#allocation10] sm:$0xff] %v644_v24 }
 0x230   :  { %367 = vst [vmem:[#allocation11] sm:$0xff] %v646_v25 }
 0x231   :  { %746 = shalt.err (!%p743_p8)
}
 0x232   :  { %s747_s18 = scalar_lea.hbm %s979_s7, 128 }
 0x233   :  { %p748_p9 = scmp.ne.s32.totalorder %s979_s7, %s747_s18  ;;  %p751_p10 = scmp.lt.u32.totalorder %s747_s18, %s979_s7 }
 0x235   :  { %p753_p11 = pnand %p751_p10, %p748_p9 }
 0x237   :  { %756 = shalt.err (!%p753_p11)
}
 0x238   :  { %377 = dma.vmem_to_hbm [thread:$0]  %s375_s12, 128, %s979_s7, [#allocation4]  }
 0x239   :  { %s757_s25 = scalar_lea.vmem %s941_s14, 128  ;;  %p762_p13 = scmp.lt.s32.totalorder %s941_s14, %s941_s14 }
 0x23a   :  { %p758_p12 = scmp.ne.s32.totalorder %s941_s14, %s757_s25  ;;  %p763_p0 = scmp.lt.s32.totalorder %s757_s25, %s757_s25 }
 0x23c   :  { %p764_p1 = por %p763_p0, %p762_p13 }
 0x23e   :  { %p765_p2 = pnand %p764_p1, %p758_p12 }
 0x240   :  { %768 = shalt.err (!%p765_p2)
}
 0x241   :  { %s769_s29 = scalar_lea.hbm %s980_s8, 128 }
 0x242   :  { %p770_p3 = scmp.ne.s32.totalorder %s980_s8, %s769_s29  ;;  %p773_p4 = scmp.lt.u32.totalorder %s769_s29, %s980_s8 }
 0x244   :  { %p775_p5 = pnand %p773_p4, %p770_p3 }
 0x246   :  { %778 = shalt.err (!%p775_p5)
}
 0x247   :  { %387 = dma.vmem_to_hbm [thread:$0]  %s941_s14, 128, %s980_s8, [#allocation12]  }
 0x248   :  { %785 = dma.done.wait [#allocation4], 128  }
 0x249   :  { %786 = vsyncadd [#allocation4], 4294967168 }
 0x24a   :  { %787 = dma.done.wait [#allocation12], 128  }
 0x24b   :  { %788 = vsyncadd [#allocation12], 4294967168 }
 0x24c   :  { %394 = vsyncpa [#allocation3], 1 }
 0x24d   :  { %395 = vsyncpa [#allocation6], 1 }
 0x24e   :  { %396 = vsyncpa [#allocation9], 1 }
 0x24f   :  { %397 = vsyncpa [#allocation4], 1 }
 0x250   :  { %398 = vsyncpa [#allocation12], 1 }

</bundles_post_ra>
